<compile_context>
chip_gen: v5e
topology: v5e:2x2
jax: 0.10.0
libtpu: 0.0.40
codegen_flags: <defaults>
</compile_context>

<pallas_src>
import functools
import math

import jax
import jax.numpy as jnp
import numpy as np
from jax.experimental import pallas as pl
from jax.experimental.pallas import tpu as pltpu


# ------------------------------ helpers ---------------------------------

def _tile(dim, pref):
    """Largest lane/sublane-friendly tile <= pref that divides dim (or dim)."""
    if dim <= pref:
        return dim
    for cand in range(pref, 127, -128):       # multiples of 128 only
        if dim % cand == 0:
            return cand
    return dim                                 # fallback: full (always legal)


@functools.lru_cache(maxsize=None)
def _vmem_limit():
    """Explicit scoped-VMEM limit: ~3/4 of physical, clamped to [32, 96] MiB."""
    cap = 64 * 1024 * 1024
    try:
        info = pltpu.get_tpu_info()
        cap = int(getattr(info, "vmem_capacity_bytes", cap))
    except Exception:
        pass
    lim = (cap * 3) // 4
    return int(max(32 * 1024 * 1024, min(lim, 96 * 1024 * 1024)))


# --------------------------- Pallas kernels -----------------------------

def _matmul_res_kernel(a_ref, b_ref, r_ref, o_ref, acc_ref):
    """o = a @ b + r ; bf16 MXU operands, f32 accumulation over grid axis 2."""
    @pl.when(pl.program_id(2) == 0)
    def _():
        acc_ref[...] = jnp.zeros_like(acc_ref)

    acc_ref[...] += jnp.dot(a_ref[...], b_ref[...],
                            preferred_element_type=jnp.float32)

    @pl.when(pl.program_id(2) == pl.num_programs(2) - 1)
    def _():
        o_ref[...] = (acc_ref[...] +
                      r_ref[...].astype(jnp.float32)).astype(o_ref.dtype)


def matmul_residual(a, b, res, *, tm=512, tn=512, tk=512,
                    out_dtype=jnp.bfloat16):
    M, K = a.shape
    K2, N = b.shape
    assert K == K2 and res.shape == (M, N)
    tm, tn, tk = _tile(M, tm), _tile(N, tn), _tile(K, tk)
    return pl.pallas_call(
        _matmul_res_kernel,
        out_shape=jax.ShapeDtypeStruct((M, N), out_dtype),
        grid=(M // tm, N // tn, K // tk),
        in_specs=[pl.BlockSpec((tm, tk), lambda i, j, k: (i, k)),
                  pl.BlockSpec((tk, tn), lambda i, j, k: (k, j)),
                  pl.BlockSpec((tm, tn), lambda i, j, k: (i, j))],
        out_specs=pl.BlockSpec((tm, tn), lambda i, j, k: (i, j)),
        scratch_shapes=[pltpu.VMEM((tm, tn), jnp.float32)],
        compiler_params=pltpu.CompilerParams(
            dimension_semantics=("parallel", "parallel", "arbitrary"),
            vmem_limit_bytes=_vmem_limit()),
    )(a, b, res)


def _rmsnorm_matmul_kernel(x_ref, g_ref, w_ref, o_ref, xn_ref, *, eps):
    """o = rmsnorm(x) @ w ; norm computed once per row tile (j == 0) into a
    bf16 VMEM scratch and reused for every output-column tile."""
    @pl.when(pl.program_id(1) == 0)
    def _():
        x = x_ref[...].astype(jnp.float32)
        ms = jnp.mean(x * x, axis=-1, keepdims=True)
        xn_ref[...] = ((x * jax.lax.rsqrt(ms + eps)) *
                       g_ref[...]).astype(jnp.bfloat16)

    o_ref[...] = jnp.dot(xn_ref[...], w_ref[...],
                         preferred_element_type=jnp.float32).astype(o_ref.dtype)


def rmsnorm_matmul(x, norm_w, w, eps, *, tm=256, tn=512,
                   out_dtype=jnp.bfloat16):
    M, D = x.shape
    D2, N = w.shape
    assert D == D2
    tm, tn = _tile(M, tm), _tile(N, tn)
    return pl.pallas_call(
        functools.partial(_rmsnorm_matmul_kernel, eps=eps),
        out_shape=jax.ShapeDtypeStruct((M, N), out_dtype),
        grid=(M // tm, N // tn),
        in_specs=[pl.BlockSpec((tm, D), lambda i, j: (i, 0)),
                  pl.BlockSpec((1, D), lambda i, j: (0, 0)),
                  pl.BlockSpec((D, tn), lambda i, j: (0, j))],
        out_specs=pl.BlockSpec((tm, tn), lambda i, j: (i, j)),
        scratch_shapes=[pltpu.VMEM((tm, D), jnp.bfloat16)],
        compiler_params=pltpu.CompilerParams(
            # j must stay sequential per core so the hoisted xn scratch is
            # always initialized at j == 0.
            dimension_semantics=("parallel", "arbitrary"),
            vmem_limit_bytes=_vmem_limit()),
    )(x, norm_w.reshape(1, D), w)


def _rmsnorm_swiglu_kernel(x_ref, g_ref, wg_ref, wu_ref, o_ref, xn_ref, *, eps):
    """o = silu(rmsnorm(x) @ wg) * (rmsnorm(x) @ wu); norm hoisted to j == 0."""
    @pl.when(pl.program_id(1) == 0)
    def _():
        x = x_ref[...].astype(jnp.float32)
        ms = jnp.mean(x * x, axis=-1, keepdims=True)
        xn_ref[...] = ((x * jax.lax.rsqrt(ms + eps)) *
                       g_ref[...]).astype(jnp.bfloat16)

    xn = xn_ref[...]
    gate = jnp.dot(xn, wg_ref[...], preferred_element_type=jnp.float32)
    up = jnp.dot(xn, wu_ref[...], preferred_element_type=jnp.float32)
    o_ref[...] = (jax.nn.silu(gate) * up).astype(o_ref.dtype)


def rmsnorm_swiglu(x, norm_w, wg, wu, eps, *, tm=256, tn=256):
    M, D = x.shape
    D2, Dh = wg.shape
    assert D == D2 and wu.shape == (D, Dh)
    tm, tn = _tile(M, tm), _tile(Dh, tn)
    return pl.pallas_call(
        functools.partial(_rmsnorm_swiglu_kernel, eps=eps),
        out_shape=jax.ShapeDtypeStruct((M, Dh), jnp.bfloat16),
        grid=(M // tm, Dh // tn),
        in_specs=[pl.BlockSpec((tm, D), lambda i, j: (i, 0)),
                  pl.BlockSpec((1, D), lambda i, j: (0, 0)),
                  pl.BlockSpec((D, tn), lambda i, j: (0, j)),
                  pl.BlockSpec((D, tn), lambda i, j: (0, j))],
        out_specs=pl.BlockSpec((tm, tn), lambda i, j: (i, j)),
        scratch_shapes=[pltpu.VMEM((tm, D), jnp.bfloat16)],
        compiler_params=pltpu.CompilerParams(
            dimension_semantics=("parallel", "arbitrary"),
            vmem_limit_bytes=_vmem_limit()),
    )(x, norm_w.reshape(1, D), wg, wu)


def _split_rope_kernel(qkv_ref, cos_ref, sin_ref, q_ref, k_ref, v_ref,
                       *, Nh, Nkv, Dhd):
    """Split the fused QKV slab into per-head q/k/v and apply RoPE once.

    Weight columns were pre-permuted per head to [even dims | odd dims], so the
    rotation uses contiguous half-splits of the head dimension."""
    hd2 = Dhd // 2
    D = Nh * Dhd
    Dkv = Nkv * Dhd
    cos = cos_ref[...]
    sin = sin_ref[...]

    def rot(xh):
        xr = xh[:, :hd2].astype(jnp.float32)
        xi = xh[:, hd2:].astype(jnp.float32)
        return jnp.concatenate([xr * cos - xi * sin, xr * sin + xi * cos],
                               axis=-1)

    for h in range(Nh):
        q_ref[0, h] = rot(qkv_ref[:, h * Dhd:(h + 1) * Dhd]).astype(q_ref.dtype)
    for h in range(Nkv):
        base = D + h * Dhd
        k_ref[0, h] = rot(qkv_ref[:, base:base + Dhd]).astype(k_ref.dtype)
        vbase = D + Dkv + h * Dhd
        v_ref[0, h] = qkv_ref[:, vbase:vbase + Dhd]


def split_heads_rope(qkv, cos, sin, *, B, L, Nh, Nkv, Dhd):
    M, W = qkv.shape
    assert M == B * L and W == (Nh + 2 * Nkv) * Dhd
    hd2 = Dhd // 2
    t = _tile(L, 256)
    nL = L // t
    return pl.pallas_call(
        functools.partial(_split_rope_kernel, Nh=Nh, Nkv=Nkv, Dhd=Dhd),
        out_shape=(jax.ShapeDtypeStruct((B, Nh, L, Dhd), jnp.bfloat16),
                   jax.ShapeDtypeStruct((B, Nkv, L, Dhd), jnp.bfloat16),
                   jax.ShapeDtypeStruct((B, Nkv, L, Dhd), jnp.bfloat16)),
        grid=(B, nL),
        in_specs=[pl.BlockSpec((t, W), lambda b, qi: (b * nL + qi, 0)),
                  pl.BlockSpec((t, hd2), lambda b, qi: (qi, 0)),
                  pl.BlockSpec((t, hd2), lambda b, qi: (qi, 0))],
        out_specs=(pl.BlockSpec((1, Nh, t, Dhd), lambda b, qi: (b, 0, qi, 0)),
                   pl.BlockSpec((1, Nkv, t, Dhd), lambda b, qi: (b, 0, qi, 0)),
                   pl.BlockSpec((1, Nkv, t, Dhd), lambda b, qi: (b, 0, qi, 0))),
        compiler_params=pltpu.CompilerParams(
            dimension_semantics=("parallel", "parallel"),
            vmem_limit_bytes=_vmem_limit()),
    )(qkv, cos, sin)


def _flash_attn_kernel(q_ref, k_ref, v_ref, o_ref, m_sc, l_sc, acc_sc, *, scale):
    qi_idx = pl.program_id(2)
    ki_idx = pl.program_id(3)
    t = q_ref.shape[2]

    @pl.when(ki_idx == 0)
    def _init():
        m_sc[...] = jnp.full_like(m_sc, -jnp.inf)
        l_sc[...] = jnp.zeros_like(l_sc)
        acc_sc[...] = jnp.zeros_like(acc_sc)

    def _update(mask_diag):
        q = q_ref[0, 0]                                   # (t, Dhd) bf16, RoPE'd
        k = k_ref[0, 0]                                   # (t, Dhd) bf16, RoPE'd
        v = v_ref[0, 0]                                   # (t, Dhd) bf16
        s = jnp.dot(q, k.T, preferred_element_type=jnp.float32) * scale
        if mask_diag:                                     # only diagonal tiles
            qpos = jax.lax.broadcasted_iota(jnp.int32, (t, t), 0)
            kpos = jax.lax.broadcasted_iota(jnp.int32, (t, t), 1)
            s = jnp.where(kpos > qpos, -jnp.inf, s)
        m_prev = m_sc[...]
        m_new = jnp.maximum(m_prev, jnp.max(s, axis=-1, keepdims=True))
        alpha = jnp.exp(m_prev - m_new)
        p = jnp.exp(s - m_new)
        l_sc[...] = alpha * l_sc[...] + jnp.sum(p, axis=-1, keepdims=True)
        acc_sc[...] = alpha * acc_sc[...] + jnp.dot(
            p.astype(jnp.bfloat16), v, preferred_element_type=jnp.float32)
        m_sc[...] = m_new

    @pl.when(ki_idx < qi_idx)          # strictly below diagonal: no mask needed
    def _():
        _update(False)

    @pl.when(ki_idx == qi_idx)         # diagonal tile: apply causal mask
    def _():
        _update(True)

    @pl.when(ki_idx == pl.num_programs(3) - 1)
    def _finalize():
        o_ref[0, 0] = (acc_sc[...] *
                       pl.reciprocal(l_sc[...], approx=True)).astype(o_ref.dtype)


def flash_attention(q, k, v, *, scale):
    """q: (B,Nh,L,Dhd) bf16 (RoPE already applied), k/v: (B,Nkv,L,Dhd) bf16."""
    B, Nh, L, Dhd = q.shape
    _, Nkv, _, _ = k.shape
    group = Nh // Nkv
    t = _tile(L, 256)
    q_spec = pl.BlockSpec((1, 1, t, Dhd), lambda b, h, qi, ki: (b, h, qi, 0))
    # Clamp the kv block index at the diagonal: above-diagonal iterations repeat
    # the previous block index, so Pallas skips the (masked) K/V DMAs entirely.
    kv_spec = pl.BlockSpec(
        (1, 1, t, Dhd),
        lambda b, h, qi, ki: (b, h // group, jnp.minimum(ki, qi), 0))
    return pl.pallas_call(
        functools.partial(_flash_attn_kernel, scale=scale),
        out_shape=jax.ShapeDtypeStruct((B, Nh, L, Dhd), jnp.bfloat16),
        grid=(B, Nh, L // t, L // t),
        in_specs=[q_spec, kv_spec, kv_spec],
        out_specs=pl.BlockSpec((1, 1, t, Dhd), lambda b, h, qi, ki: (b, h, qi, 0)),
        scratch_shapes=[pltpu.VMEM((t, 1), jnp.float32),
                        pltpu.VMEM((t, 1), jnp.float32),
                        pltpu.VMEM((t, Dhd), jnp.float32)],
        compiler_params=pltpu.CompilerParams(
            dimension_semantics=("parallel", "parallel", "parallel", "arbitrary"),
            vmem_limit_bytes=_vmem_limit()),
    )(q, k, v)


# ------------------------------ model glue ------------------------------

def init_params(key, cfg):
    """Canonical f32 parameters (weights stored as (in, out) = torch W.T)."""
    D, Nl, Nh, Nkv, V, Dh, Lm = (cfg["D"], cfg["Nl"], cfg["Nh"], cfg["Nkv"],
                                 cfg["V"], cfg["Dh"], cfg["Lm"])
    Dhd = D // Nh
    Dkv = D * Nkv // Nh
    keys = iter(jax.random.split(key, 2 + 7 * Nl))

    def w(shape):
        return 0.02 * jax.random.normal(next(keys), shape, dtype=jnp.float32)

    params = {
        "embedding": w((V, D)),
        "layers": [],
        "out_norm": jnp.ones((D,), jnp.float32),
        "wo": w((D, V)),
    }
    for _ in range(Nl):
        params["layers"].append({
            "attn_norm": jnp.ones((D,), jnp.float32),
            "wq": w((D, D)),
            "wk": w((D, Dkv)),
            "wv": w((D, Dkv)),
            "wa": w((D, D)),
            "ffn_norm": jnp.ones((D,), jnp.float32),
            "wg": w((D, Dh)),
            "wu": w((D, Dh)),
            "wd": w((Dh, D)),
        })
    theta = 1.0 / (10000.0 ** (jnp.arange(0, Dhd, 2)[: Dhd // 2]
                               .astype(jnp.float32) / Dhd))
    freqs = jnp.outer(jnp.arange(Lm, dtype=jnp.float32), theta)
    params["cos"] = jnp.cos(freqs)    # (Lm, Dhd//2)
    params["sin"] = jnp.sin(freqs)
    return params


def prepare_params(params, cfg):
    """One-time weight prep: fuse QKV, permute q/k head columns ([even|odd])
    for the contiguous-half RoPE, cast matmul weights + embedding to bf16."""
    D, Nh, Nkv = cfg["D"], cfg["Nh"], cfg["Nkv"]
    Dhd = D // Nh
    assert Dhd % 2 == 0
    perm = np.concatenate([np.arange(0, Dhd, 2), np.arange(1, Dhd, 2)])
    q_perm = np.concatenate([h * Dhd + perm for h in range(Nh)])
    k_perm = np.concatenate([h * Dhd + perm for h in range(Nkv)])
    fast = {
        "embedding": params["embedding"].astype(jnp.bfloat16),
        "cos": params["cos"], "sin": params["sin"],
        "out_norm": params["out_norm"],
        "wo": params["wo"].astype(jnp.bfloat16),
        "layers": [],
    }
    for lyr in params["layers"]:
        wqkv = jnp.concatenate([lyr["wq"][:, q_perm], lyr["wk"][:, k_perm],
                                lyr["wv"]], axis=1).astype(jnp.bfloat16)
        fast["layers"].append({
            "attn_norm": lyr["attn_norm"],
            "wqkv": wqkv,
            "wa": lyr["wa"].astype(jnp.bfloat16),
            "ffn_norm": lyr["ffn_norm"],
            "wg": lyr["wg"].astype(jnp.bfloat16),
            "wu": lyr["wu"].astype(jnp.bfloat16),
            "wd": lyr["wd"].astype(jnp.bfloat16),
        })
    return fast


def pallas_forward(fast, ti, cfg):
    D, Nh, Nkv, V, E = cfg["D"], cfg["Nh"], cfg["Nkv"], cfg["V"], cfg["E"]
    B, L = ti.shape
    Dhd = D // Nh
    scale = 1.0 / math.sqrt(Dhd)
    cos = fast["cos"][:L]
    sin = fast["sin"][:L]
    # TODO(synk): embedding row-gather stays in plain JAX (dynamic gather glue).
    xi = fast["embedding"][ti].reshape(B * L, D)                     # bf16
    for lyr in fast["layers"]:
        # fused attention_norm + (wq|wk|wv) projection, bf16 out
        qkv = rmsnorm_matmul(xi, lyr["attn_norm"], lyr["wqkv"], E)   # (M, D+2Dkv)
        # split heads + RoPE (applied once) in a single Pallas kernel
        q, k, v = split_heads_rope(qkv, cos, sin,
                                   B=B, L=L, Nh=Nh, Nkv=Nkv, Dhd=Dhd)
        sa = flash_attention(q, k, v, scale=scale)                   # (B,Nh,L,Dhd)
        # TODO(synk): head-merge transpose left to XLA; could fold into a
        # lane-dense flash out_spec when Dhd % 128 == 0.
        sac = sa.transpose(0, 2, 1, 3).reshape(B * L, D)
        ha = matmul_residual(sac, lyr["wa"], xi)                     # + xi fused
        h = rmsnorm_swiglu(ha, lyr["ffn_norm"], lyr["wg"], lyr["wu"], E)
        xi = matmul_residual(h, lyr["wd"], ha)                       # + ha fused
    lo = rmsnorm_matmul(xi, fast["out_norm"], fast["wo"], E,
                        out_dtype=jnp.float32)                       # norm + head
    return lo.reshape(B, L, V)


def reference_forward(params, ti, cfg):
    """Pure-JAX f32 mirror of the PyTorch forward (for verification)."""
    D, Nh, Nkv, E = cfg["D"], cfg["Nh"], cfg["Nkv"], cfg["E"]
    B, L = ti.shape
    Dhd = D // Nh
    cos = params["cos"][:L].reshape(1, L, 1, Dhd // 2)
    sin = params["sin"][:L].reshape(1, L, 1, Dhd // 2)
    m = jnp.triu(jnp.full((1, 1, L, L), -jnp.inf, dtype=jnp.float32), k=1)
    xi = params["embedding"][ti]

    def rms(x, w):
        return x * jax.lax.rsqrt(jnp.mean(x * x, -1, keepdims=True) + E) * w

    for lyr in params["layers"]:
        xi1 = rms(xi, lyr["attn_norm"])
        q = xi1 @ lyr["wq"]
        k = xi1 @ lyr["wk"]
        v = xi1 @ lyr["wv"]
        q1 = q.reshape(B, L, Nh, Dhd // 2, 2)
        k1 = k.reshape(B, L, Nkv, Dhd // 2, 2)
        v1 = v.reshape(B, L, Nkv, Dhd)
        qr, qi = q1[..., 0], q1[..., 1]
        kr, ki = k1[..., 0], k1[..., 1]
        qr1, qi1 = qr * cos - qi * sin, qr * sin + qi * cos
        kr1, ki1 = kr * cos - ki * sin, kr * sin + ki * cos
        q2 = jnp.stack([qr1, qi1], axis=-1).reshape(B, L, Nh, Dhd)
        k2 = jnp.stack([kr1, ki1], axis=-1).reshape(B, L, Nkv, Dhd)
        kx = jnp.repeat(k2, Nh // Nkv, axis=2)
        vx = jnp.repeat(v1, Nh // Nkv, axis=2)
        qt, kt, vt = (t.transpose(0, 2, 1, 3) for t in (q2, kx, vx))
        a = qt @ kt.transpose(0, 1, 3, 2) / math.sqrt(Dhd)
        as_ = jax.nn.softmax(a + m, axis=-1)
        sa = as_ @ vt
        sac1 = sa.transpose(0, 2, 1, 3).reshape(B, L, D)
        ha = sac1 @ lyr["wa"] + xi
        hi = rms(ha, lyr["ffn_norm"])
        hm = jax.nn.silu(hi @ lyr["wg"]) * (hi @ lyr["wu"])
        xi = hm @ lyr["wd"] + ha
    xo = rms(xi, params["out_norm"])
    return xo @ params["wo"]


if __name__ == "__main__":
    cfg = dict(D=32, Nl=2, Nh=4, Nkv=2, V=64, Dh=64, E=1e-5, Lm=16)
    B, L = 2, 8
    key = jax.random.PRNGKey(0)
    kp, kt = jax.random.split(key)
    params = init_params(kp, cfg)
    fast = prepare_params(params, cfg)
    ti = jax.random.randint(kt, (B, L), 0, cfg["V"], dtype=jnp.int32)

    out = pallas_forward(fast, ti, cfg)
    out = jax.block_until_ready(out)

    ref = reference_forward(params, ti, cfg)
    # bf16 weights/activations + approximate reciprocal -> loose tolerance.
    np.testing.assert_allclose(np.asarray(out), np.asarray(ref),
                               rtol=2e-2, atol=2e-2)
    print("KERNEL_OK")
</pallas_src>

<mosaic_0001>
module attributes {stable_mosaic.version = 11 : i64} {
  func.func @_rmsnorm_matmul_kernel(%arg0: i32, %arg1: i32, %arg2: memref<16x32xbf16, #tpu.memory_space<vmem>>, %arg3: memref<1x32xf32, #tpu.memory_space<vmem>>, %arg4: memref<32x64xbf16, #tpu.memory_space<vmem>>, %arg5: memref<16x64xbf16, #tpu.memory_space<vmem>>, %arg6: memref<16x32xbf16, #tpu.memory_space<vmem>>) attributes {dimension_semantics = [#tpu.dimension_semantics<parallel>, #tpu.dimension_semantics<arbitrary>], iteration_bounds = array<i64: 1, 1>, scalar_prefetch = 0 : i64, scratch_operands = 1 : i64, tpu.core_type = #tpu.core_type<tc>, window_params = [{transform_indices = @transform_0, window_bounds = array<i64: 16, 32>}, {pipeline_mode = #tpu.pipeline_mode<synchronous>, transform_indices = @transform_1, window_bounds = array<i64: 1, 32>}, {transform_indices = @transform_2, window_bounds = array<i64: 32, 64>}, {transform_indices = @transform_3, window_bounds = array<i64: 16, 64>}]} {
    %c0_i32 = arith.constant 0 : i32
    %0 = arith.cmpi eq, %arg1, %c0_i32 : i32
    %1 = arith.extui %0 : i1 to i32
    %c0_i32_0 = arith.constant 0 : i32
    %2 = arith.cmpi ne, %1, %c0_i32_0 : i32
    scf.if %2 {
      %c0_6 = arith.constant 0 : index
      %c0_7 = arith.constant 0 : index
      %8 = vector.load %arg2[%c0_6, %c0_7] : memref<16x32xbf16, #tpu.memory_space<vmem>>, vector<16x32xbf16>
      %9 = arith.extf %8 : vector<16x32xbf16> to vector<16x32xf32>
      %10 = arith.mulf %9, %9 : vector<16x32xf32>
      %cst_8 = arith.constant dense<0.000000e+00> : vector<16xf32>
      %11 = vector.multi_reduction <add>, %10, %cst_8 [1] : vector<16x32xf32> to vector<16xf32>
      %12 = vector.shape_cast %11 : vector<16xf32> to vector<16x1xf32>
      %cst_9 = arith.constant 3.200000e+01 : f32
      %13 = vector.broadcast %cst_9 : f32 to vector<16x1xf32>
      %14 = arith.divf %12, %13 : vector<16x1xf32>
      %cst_10 = arith.constant 9.99999974E-6 : f32
      %15 = vector.broadcast %cst_10 : f32 to vector<16x1xf32>
      %16 = arith.addf %14, %15 : vector<16x1xf32>
      %17 = math.rsqrt %16 : vector<16x1xf32>
      %18 = vector.broadcast %17 : vector<16x1xf32> to vector<16x32xf32>
      %19 = arith.mulf %9, %18 : vector<16x32xf32>
      %c0_11 = arith.constant 0 : index
      %c0_12 = arith.constant 0 : index
      %20 = vector.load %arg3[%c0_11, %c0_12] : memref<1x32xf32, #tpu.memory_space<vmem>>, vector<1x32xf32>
      %21 = vector.broadcast %20 : vector<1x32xf32> to vector<16x32xf32>
      %22 = arith.mulf %19, %21 : vector<16x32xf32>
      %23 = arith.truncf %22 : vector<16x32xf32> to vector<16x32xbf16>
      %c0_13 = arith.constant 0 : index
      %c0_14 = arith.constant 0 : index
      %24 = vector.load %arg6[%c0_13, %c0_14] : memref<16x32xbf16, #tpu.memory_space<vmem>>, vector<16x32xbf16>
      tpu.vector_store %arg6[%c0_13, %c0_14], %23 {strides = array<i32>} : memref<16x32xbf16, #tpu.memory_space<vmem>>, vector<16x32xbf16>,
    } else {
    }
    %c0 = arith.constant 0 : index
    %c0_1 = arith.constant 0 : index
    %3 = vector.load %arg6[%c0, %c0_1] : memref<16x32xbf16, #tpu.memory_space<vmem>>, vector<16x32xbf16>
    %c0_2 = arith.constant 0 : index
    %c0_3 = arith.constant 0 : index
    %4 = vector.load %arg4[%c0_2, %c0_3] : memref<32x64xbf16, #tpu.memory_space<vmem>>, vector<32x64xbf16>
    %cst = arith.constant dense<0.000000e+00> : vector<16x64xf32>
    %5 = tpu.matmul %3, %4, %cst {dimension_numbers = #tpu.dot_dimension_numbers<[1], [0], [0], [1], [0, 0, 1, 1], [], []>} : vector<16x32xbf16>, vector<32x64xbf16>, vector<16x64xf32> -> vector<16x64xf32>
    %6 = arith.truncf %5 : vector<16x64xf32> to vector<16x64xbf16>
    %c0_4 = arith.constant 0 : index
    %c0_5 = arith.constant 0 : index
    %7 = vector.load %arg5[%c0_4, %c0_5] : memref<16x64xbf16, #tpu.memory_space<vmem>>, vector<16x64xbf16>
    tpu.vector_store %arg5[%c0_4, %c0_5], %6 {strides = array<i32>} : memref<16x64xbf16, #tpu.memory_space<vmem>>, vector<16x64xbf16>,
    return
  }
  func.func @transform_0(%arg0: i32, %arg1: i32) -> (i32, i32) {
    %c0_i32 = arith.constant 0 : i32
    %c0_i32_0 = arith.constant 0 : i32
    return %arg0, %c0_i32 : i32, i32
  }
  func.func @transform_1(%arg0: i32, %arg1: i32) -> (i32, i32) {
    %c0_i32 = arith.constant 0 : i32
    %c0_i32_0 = arith.constant 0 : i32
    %c0_i32_1 = arith.constant 0 : i32
    return %c0_i32, %c0_i32_0 : i32, i32
  }
  func.func @transform_2(%arg0: i32, %arg1: i32) -> (i32, i32) {
    %c0_i32 = arith.constant 0 : i32
    %c0_i32_0 = arith.constant 0 : i32
    return %c0_i32, %arg1 : i32, i32
  }
  func.func @transform_3(%arg0: i32, %arg1: i32) -> (i32, i32) {
    %c0_i32 = arith.constant 0 : i32
    return %arg0, %arg1 : i32, i32
  }
}

</mosaic_0001>

<bundles_post_ra>
// kernel: tpu_custom_call.1
= control target key start
LH: loop header
LB: loop body
LE: loop exit
PB: predicated region body
PF: predicated region fallthrough
CT: control target
= control target key end

     0   :  { %8 = vsyncpa [#allocation4], 0  ;;  %s375_s0 = inlined_call_operand.hbm [shape: bf16[16,32], index: 0, kind: input, shape index: {}]   ;;  %s376_s1 = inlined_call_operand.hbm [shape: f32[1,32], index: 1, kind: input, shape index: {}]   ;;  %s377_s2 = inlined_call_operand.hbm [shape: bf16[32,64], index: 2, kind: input, shape index: {}]   ;;  %s378_s3 = inlined_call_operand.hbm [shape: bf16[16,64], index: 3, kind: output, shape index: {}]  }
   0x1   :  { %9 = vsyncpa [#allocation7], 0  ;;  %s29_s14 = sshll.u32 %s376_s1, 4  ;;  %s30_s14 = int_to_ptr.hbm [resolvable:$true] %s29_s14 }
   0x2   :  { %10 = vsyncpa [#allocation5], 0  ;;  %s324_s15 = smov [#allocation6]   ;;  %s15_s19 = sshll.u32 %s375_s0, 4  ;;  %s16_s19 = int_to_ptr.hbm [resolvable:$true] %s15_s19 }
   0x3   :  { %s31_s16 = sshll.u32 %s324_s15, 4  ;;  %s325_s20 = smov [#allocation3]   ;;  %s32_s16 = int_to_ptr.vmem [resolvable:$true] %s31_s16 }
   0x4   :  { %34 = dma.hbm_to_vmem [thread:$0]  %s30_s14, 16, %s32_s16, [#allocation7]  }
   0x5   :  { %s17_s21 = sshll.u32 %s325_s20, 4  ;;  %s326_s22 = smov 64   ;;  %s18_s21 = int_to_ptr.vmem [resolvable:$true] %s17_s21 }
   0x6   :  { %s327_s23 = smov 4   ;;  %s39_s25 = sshll.u32 %s377_s2, 4  ;;  %s40_s25 = int_to_ptr.hbm [resolvable:$true] %s39_s25 }
   0x7   :  { %23 = dma.hbm_to_vmem [thread:$0]  %s16_s19, 128, %s18_s21, [#allocation4], %s326_s22, %s326_s22, %s327_s23  }
   0x8   :  { %s328_s26 = smov [#allocation8]  }
   0x9   :  { %s41_s27 = sshll.u32 %s328_s26, 4  ;;  %s42_s27 = int_to_ptr.vmem [resolvable:$true] %s41_s27 }
   0xa   :  { %47 = dma.hbm_to_vmem [thread:$0]  %s40_s25, 256, %s42_s27, [#allocation7], %s326_s22, %s326_s22, %s327_s23  }
   0xb   :  { %318 = dma.done.wait [#allocation4], 128  }
   0xc   :  { %319 = vsyncadd [#allocation4], 4294967168 }
   0xd   :  { %320 = dma.done.wait [#allocation7], 272  }
   0xe   :  { %321 = vsyncadd [#allocation7], 4294967024  ;;  %v205_v0 = vld [vmem:[#allocation3] sm:$0xff]   ;;  %vm71_vm0 = vcmask 261120   ;;  %v329_v7 = vmov 32.0   ;;  %v203_v17 = vld [vmem:[#allocation8 + $0x8] sm:$0xff] }
   0xf   :  { %v206_v1 = vunpack.c.l.bf16 %v205_v0  ;;  %v207_v3 = vunpack.c.h.bf16 %v205_v0  ;;  %216 = vrcp.f32 %v329_v7  ;;  %155 = vmatpush.bf16.msra.mxu0 %v203_v17  ;;  %v202_v18 = vld [vmem:[#allocation8] sm:$0xff]  ;;  %v215_v30 = vld [vmem:[#allocation6] ss:$0 sm:$0xff]  ;;  %vm119_vm5 = vcmask 257024   ;;  %s330_s0 = smov [#allocation9]   ;;  %s174_s30 = sshll.u32 %s378_s3, 4  ;;  %s175_s30 = int_to_ptr.hbm [resolvable:$true] %s174_s30 }
  0x10   :  { %vm165_vm9 = vcmask 519168   ;;  %s172_s2 = sshll.u32 %s330_s0, 4  ;;  %s173_s2 = int_to_ptr.vmem [resolvable:$true] %s172_s2 }
  0x11   :  { %v69_v2 = vmul.f32 %v206_v1, %v206_v1  ;;  %v70_v5 = vmul.f32 %v207_v3, %v207_v3 }
  0x13   :  { %v72_v4 = vsel %vm71_vm0, %v69_v2, 0.0  ;;  %v75_v6 = vsel %vm71_vm0, %v70_v5, 0.0  ;;  %156 = vmatpush.bf16.msra.mxu0 %v202_v18 }
  0x14   :  { %73 = vadd.xlane.f32.xlu0 %v72_v4 }
  0x15   :  { %v217_v8 = vpop.eup %216 }
  0x16   :  { %v79_v9 = vmul.f32 32.0, %v217_v8  ;;  %vm83_vm1 = vweird.f32 %v217_v8 }
  0x18   :  { %v80_v10 = vsub.f32 1.0, %v79_v9 }
  0x1a   :  { %v81_v11 = vmul.f32 %v217_v8, %v80_v10 }
  0x1c   :  { %76 = vadd.xlane.f32.xlu0 %v75_v6  ;;  %v82_v12 = vadd.f32 %v217_v8, %v81_v11 }
  0x1e   :  { %v84_v13 = vsel %vm83_vm1, %v217_v8, %v82_v12 }
  0x87   :  { %v74_v14 = vpop.xlane.xlu0 %73 }
  0x88   :  { %v85_v15 = vmul.f32 %v84_v13, %v74_v14 }
  0x8a   :  { %v87_v16 = vadd.f32 1e-05, %v85_v15 }
  0x8c   :  { %218 = vrsqrt.f32 %v87_v16  ;;  %vm95_vm3 = vweird.f32 %v87_v16 }
  0x8f   :  { %v77_v19 = vpop.xlane.xlu0 %76 }
  0x90   :  { %v86_v20 = vmul.f32 %v84_v13, %v77_v19 }
  0x92   :  { %v219_v21 = vpop.eup %218  ;;  %v88_v22 = vadd.f32 1e-05, %v86_v20 }
  0x93   :  { %v90_v23 = vmul.f32 %v219_v21, %v87_v16  ;;  %vm96_vm2 = vweird.f32 %v219_v21 }
  0x94   :  { %220 = vrsqrt.f32 %v88_v22  ;;  %vm97_vm4 = vmor %vm95_vm3, %vm96_vm2  ;;  %vm105_vm7 = vweird.f32 %v88_v22 }
  0x95   :  { %v91_v24 = vmul.f32 %v219_v21, %v90_v23 }
  0x97   :  { %v92_v25 = vmul.f32 0.5, %v91_v24 }
  0x99   :  { %v93_v26 = vsub.f32 1.5, %v92_v25 }
  0x9a   :  { %v221_v27 = vpop.eup %220 }
  0x9b   :  { %v94_v28 = vmul.f32 %v219_v21, %v93_v26  ;;  %v100_v29 = vmul.f32 %v221_v27, %v88_v22  ;;  %vm106_vm6 = vweird.f32 %v221_v27 }
  0x9c   :  { %vm107_vm8 = vmor %vm105_vm7, %vm106_vm6 }
  0x9d   :  { %v98_v31 = vsel %vm97_vm4, %v219_v21, %v94_v28  ;;  %v101_v32 = vmul.f32 %v221_v27, %v100_v29 }
  0x9e   :  { %v109_v33 = vmul.f32 %v206_v1, %v98_v31 }
  0x9f   :  { %v102_v34 = vmul.f32 0.5, %v101_v32 }
  0xa0   :  { %v115_v35 = vmul.f32 %v215_v30, %v109_v33 }
  0xa1   :  { %v103_v36 = vsub.f32 1.5, %v102_v34 }
  0xa2   :  { %v117_v37 = vpack.c.bf16 %v115_v35, %v115_v35 }
  0xa3   :  { %v104_v38 = vmul.f32 %v221_v27, %v103_v36 }
  0xa4   :  { %120 = vst.msk [vmem:[#allocation2] sm:$0xf] %vm119_vm5, %v117_v37 }
  0xa5   :  { %v108_v39 = vsel %vm107_vm8, %v221_v27, %v104_v38 }
  0xa6   :  { %v110_v40 = vmul.f32 %v207_v3, %v108_v39 }
  0xa8   :  { %v116_v41 = vmul.f32 %v215_v30, %v110_v40 }
  0xaa   :  { %v118_v42 = vpack.c.bf16 %v116_v41, %v116_v41 }
  0xac   :  { %121 = vst.msk [vmem:[#allocation2 + $0x4] sm:$0xf] %vm119_vm5, %v118_v42 }
  0xb3   :  { %v201_v43 = vld [vmem:[#allocation2] sm:$0xff] }
  0xb4   :  { %200 = vmatmul.msk.bf16.vlgmr.msra.gmra.mxu0 %vm71_vm0, %v201_v43 }
 0x131   :  { %v158_v44 = vpop.f32.mrf.mxu0 }
 0x132   :  { %v163_v45 = vpack.c.bf16 %v158_v44, %v158_v44 }
 0x134   :  { %166 = vst.msk [vmem:[#allocation9] sm:$0xf] %vm165_vm9, %v163_v45 }
 0x139   :  { %v160_v46 = vpop.f32.mrf.mxu0 }
 0x13a   :  { %v164_v47 = vpack.c.bf16 %v160_v46, %v160_v46 }
 0x13c   :  { %167 = vst.msk [vmem:[#allocation9 + $0x4] sm:$0xf] %vm165_vm9, %v164_v47 }
 0x13d   :  { %180 = dma.vmem_to_hbm [thread:$0]  %s173_s2, 128, %s175_s30, [#allocation5], %s326_s22, %s326_s22, %s327_s23  }
 0x13e   :  { %322 = dma.done.wait [#allocation5], 128  }
 0x13f   :  { %323 = vsyncadd [#allocation5], 4294967168 }
 0x140   :  { %185 = vsyncpa [#allocation4], 1 }
 0x141   :  { %186 = vsyncpa [#allocation7], 1 }
 0x142   :  { %187 = vsyncpa [#allocation5], 1 }

</bundles_post_ra>
